<compile_context>
chip_gen: v5e
topology: v5e:2x2
jax: 0.10.0
libtpu: 0.0.40
codegen_flags: <defaults>
</compile_context>

<pallas_src>
import functools

import jax
import jax.numpy as jnp
from jax.experimental import pallas as pl
from jax.experimental.pallas import tpu as pltpu

D_IN, H1, H2, D_OUT = 784, 128, 64, 10


def mlp_kernel(x_ref, w1_ref, b1_ref, w2_ref, b2_ref, w3_ref, b3_ref, o_ref):
    # fc1 -> fc2 -> fc3, no nonlinearity (matches the reference nn.Module).
    # bf16 MXU operands, f32 accumulation, f32 bias adds. x cast happens here
    # (VPU has slack; hides under the input DMA).
    x = x_ref[...].astype(jnp.bfloat16)
    h1 = jnp.dot(x, w1_ref[...], preferred_element_type=jnp.float32) + b1_ref[...]
    h2 = (
        jnp.dot(h1.astype(jnp.bfloat16), w2_ref[...],
                preferred_element_type=jnp.float32)
        + b2_ref[...]
    )
    o_ref[...] = (
        jnp.dot(h2.astype(jnp.bfloat16), w3_ref[...],
                preferred_element_type=jnp.float32)
        + b3_ref[...]
    )


def _round_up(n, m):
    return ((n + m - 1) // m) * m


def prepare_params(w1, b1, w2, b2, w3, b3):
    """One-time (model-load) preprocessing: bf16 weights, (1, out) f32 biases."""
    return (
        w1.astype(jnp.bfloat16), jnp.reshape(b1, (1, H1)).astype(jnp.float32),
        w2.astype(jnp.bfloat16), jnp.reshape(b2, (1, H2)).astype(jnp.float32),
        w3.astype(jnp.bfloat16), jnp.reshape(b3, (1, D_OUT)).astype(jnp.float32),
    )


@functools.partial(jax.jit, static_argnames=("block_b",))
def mlp_forward(x, w1b, b1, w2b, b2, w3b, b3, *, block_b=1024):
    """x: (B, 784) f32; w_i: bf16 (in, out); b_i: f32 (1, out). Returns (B, 10) f32."""
    B = x.shape[0]

    # Batch tile: multiple of 8 sublanes, capped at block_b, and aim for >= 2
    # grid steps so the parallel axis shards across both TCs on v7x.
    tb = min(block_b, max(8, _round_up(pl.cdiv(B, 2), 8)))
    grid = (pl.cdiv(B, tb),)

    def const_spec(shape):
        return pl.BlockSpec(shape, lambda i: (0,) * len(shape))

    flops = 2 * B * (D_IN * H1 + H1 * H2 + H2 * D_OUT)
    weight_bytes = (w1b.size + w2b.size + w3b.size) * 2
    bias_bytes = (b1.size + b2.size + b3.size) * 4
    bytes_accessed = x.size * 4 + weight_bytes + bias_bytes + B * D_OUT * 4

    # VMEM budget: double-buffered f32 x block + f32 out block + resident
    # (double-buffered) weights/biases, plus headroom. Well under the 32 MiB
    # scoped default on v6e/v7x and v5e's 128 MiB physical.
    vmem_needed = (
        2 * tb * D_IN * 4 + 2 * tb * D_OUT * 4 + 2 * (weight_bytes + bias_bytes)
    )
    vmem_limit = min(max(vmem_needed + (2 << 20), 8 << 20), 32 << 20)

    return pl.pallas_call(
        mlp_kernel,
        out_shape=jax.ShapeDtypeStruct((B, D_OUT), jnp.float32),
        grid=grid,
        in_specs=[
            pl.BlockSpec((tb, D_IN), lambda i: (i, 0)),   # x tile, double-buffered
            const_spec((D_IN, H1)),                       # w1 (bf16), VMEM-resident
            const_spec((1, H1)),                          # b1
            const_spec((H1, H2)),                         # w2 (bf16)
            const_spec((1, H2)),                          # b2
            const_spec((H2, D_OUT)),                      # w3 (bf16)
            const_spec((1, D_OUT)),                       # b3
        ],
        out_specs=pl.BlockSpec((tb, D_OUT), lambda i: (i, 0)),
        compiler_params=pltpu.CompilerParams(
            dimension_semantics=("parallel",),
            vmem_limit_bytes=vmem_limit,
        ),
        cost_estimate=pl.CostEstimate(
            flops=flops, transcendentals=0, bytes_accessed=bytes_accessed
        ),
    )(x, w1b, b1, w2b, b2, w3b, b3)


def init_params(key):
    # Deterministic init mimicking nn.Linear default (uniform(+/- 1/sqrt(fan_in))).
    dims = [(D_IN, H1), (H1, H2), (H2, D_OUT)]
    params = []
    for i, (fan_in, fan_out) in enumerate(dims):
        kw, kb = jax.random.split(jax.random.fold_in(key, i))
        bound = 1.0 / jnp.sqrt(fan_in)
        w = jax.random.uniform(
            kw, (fan_in, fan_out), jnp.float32, minval=-bound, maxval=bound
        )
        b = jax.random.uniform(
            kb, (1, fan_out), jnp.float32, minval=-bound, maxval=bound
        )
        params.extend([w, b])
    return params


if __name__ == "__main__":
    key = jax.random.PRNGKey(0)
    kx, kp = jax.random.split(key)
    B = 8
    x = jax.random.normal(kx, (B, D_IN), dtype=jnp.float32)
    w1, b1, w2, b2, w3, b3 = init_params(kp)

    # One-time weight preprocessing (hoisted out of the hot path).
    prepped = prepare_params(w1, b1, w2, b2, w3, b3)

    out = mlp_forward(x, *prepped)
    out = jax.block_until_ready(out)

    # Pure-JAX f32 reference of the forward-pass semantics (kernel uses bf16
    # matmul operands with f32 accumulation, so use loosened tolerances).
    ref = ((x @ w1 + b1) @ w2 + b2) @ w3 + b3
    assert out.shape == (B, D_OUT)
    assert jnp.allclose(out, ref, atol=2e-2, rtol=2e-2), (
        float(jnp.max(jnp.abs(out - ref)))
    )

    print("KERNEL_OK")
</pallas_src>

<mosaic_0001>
module attributes {stable_mosaic.version = 11 : i64} {
  func.func @mlp_kernel(%arg0: i32, %arg1: memref<8x784xf32, #tpu.memory_space<vmem>>, %arg2: memref<784x128xbf16, #tpu.memory_space<vmem>>, %arg3: memref<1x128xf32, #tpu.memory_space<vmem>>, %arg4: memref<128x64xbf16, #tpu.memory_space<vmem>>, %arg5: memref<1x64xf32, #tpu.memory_space<vmem>>, %arg6: memref<64x10xbf16, #tpu.memory_space<vmem>>, %arg7: memref<1x10xf32, #tpu.memory_space<vmem>>, %arg8: memref<8x10xf32, #tpu.memory_space<vmem>>) attributes {dimension_semantics = [#tpu.dimension_semantics<parallel>], iteration_bounds = array<i64: 1>, scalar_prefetch = 0 : i64, scratch_operands = 0 : i64, tpu.core_type = #tpu.core_type<tc>, window_params = [{transform_indices = @transform_0, window_bounds = array<i64: 8, 784>}, {pipeline_mode = #tpu.pipeline_mode<synchronous>, transform_indices = @transform_1, window_bounds = array<i64: 784, 128>}, {pipeline_mode = #tpu.pipeline_mode<synchronous>, transform_indices = @transform_2, window_bounds = array<i64: 1, 128>}, {pipeline_mode = #tpu.pipeline_mode<synchronous>, transform_indices = @transform_3, window_bounds = array<i64: 128, 64>}, {pipeline_mode = #tpu.pipeline_mode<synchronous>, transform_indices = @transform_4, window_bounds = array<i64: 1, 64>}, {pipeline_mode = #tpu.pipeline_mode<synchronous>, transform_indices = @transform_5, window_bounds = array<i64: 64, 10>}, {pipeline_mode = #tpu.pipeline_mode<synchronous>, transform_indices = @transform_6, window_bounds = array<i64: 1, 10>}, {transform_indices = @transform_7, window_bounds = array<i64: 8, 10>}]} {
    %c0 = arith.constant 0 : index
    %c0_0 = arith.constant 0 : index
    %0 = vector.load %arg1[%c0, %c0_0] : memref<8x784xf32, #tpu.memory_space<vmem>>, vector<8x784xf32>
    %1 = arith.truncf %0 : vector<8x784xf32> to vector<8x784xbf16>
    %c0_1 = arith.constant 0 : index
    %c0_2 = arith.constant 0 : index
    %2 = vector.load %arg2[%c0_1, %c0_2] : memref<784x128xbf16, #tpu.memory_space<vmem>>, vector<784x128xbf16>
    %cst = arith.constant dense<0.000000e+00> : vector<8x128xf32>
    %3 = tpu.matmul %1, %2, %cst {dimension_numbers = #tpu.dot_dimension_numbers<[1], [0], [0], [1], [0, 0, 1, 1], [], []>} : vector<8x784xbf16>, vector<784x128xbf16>, vector<8x128xf32> -> vector<8x128xf32>
    %c0_3 = arith.constant 0 : index
    %c0_4 = arith.constant 0 : index
    %4 = vector.load %arg3[%c0_3, %c0_4] : memref<1x128xf32, #tpu.memory_space<vmem>>, vector<1x128xf32>
    %5 = vector.broadcast %4 : vector<1x128xf32> to vector<8x128xf32>
    %6 = arith.addf %3, %5 : vector<8x128xf32>
    %7 = arith.truncf %6 : vector<8x128xf32> to vector<8x128xbf16>
    %c0_5 = arith.constant 0 : index
    %c0_6 = arith.constant 0 : index
    %8 = vector.load %arg4[%c0_5, %c0_6] : memref<128x64xbf16, #tpu.memory_space<vmem>>, vector<128x64xbf16>
    %cst_7 = arith.constant dense<0.000000e+00> : vector<8x64xf32>
    %9 = tpu.matmul %7, %8, %cst_7 {dimension_numbers = #tpu.dot_dimension_numbers<[1], [0], [0], [1], [0, 0, 1, 1], [], []>} : vector<8x128xbf16>, vector<128x64xbf16>, vector<8x64xf32> -> vector<8x64xf32>
    %c0_8 = arith.constant 0 : index
    %c0_9 = arith.constant 0 : index
    %10 = vector.load %arg5[%c0_8, %c0_9] : memref<1x64xf32, #tpu.memory_space<vmem>>, vector<1x64xf32>
    %11 = vector.broadcast %10 : vector<1x64xf32> to vector<8x64xf32>
    %12 = arith.addf %9, %11 : vector<8x64xf32>
    %13 = arith.truncf %12 : vector<8x64xf32> to vector<8x64xbf16>
    %c0_10 = arith.constant 0 : index
    %c0_11 = arith.constant 0 : index
    %14 = vector.load %arg6[%c0_10, %c0_11] : memref<64x10xbf16, #tpu.memory_space<vmem>>, vector<64x10xbf16>
    %cst_12 = arith.constant dense<0.000000e+00> : vector<8x10xf32>
    %15 = tpu.matmul %13, %14, %cst_12 {dimension_numbers = #tpu.dot_dimension_numbers<[1], [0], [0], [1], [0, 0, 1, 1], [], []>} : vector<8x64xbf16>, vector<64x10xbf16>, vector<8x10xf32> -> vector<8x10xf32>
    %c0_13 = arith.constant 0 : index
    %c0_14 = arith.constant 0 : index
    %16 = vector.load %arg7[%c0_13, %c0_14] : memref<1x10xf32, #tpu.memory_space<vmem>>, vector<1x10xf32>
    %17 = vector.broadcast %16 : vector<1x10xf32> to vector<8x10xf32>
    %18 = arith.addf %15, %17 : vector<8x10xf32>
    %c0_15 = arith.constant 0 : index
    %c0_16 = arith.constant 0 : index
    %19 = vector.load %arg8[%c0_15, %c0_16] : memref<8x10xf32, #tpu.memory_space<vmem>>, vector<8x10xf32>
    tpu.vector_store %arg8[%c0_15, %c0_16], %18 {strides = array<i32>} : memref<8x10xf32, #tpu.memory_space<vmem>>, vector<8x10xf32>,
    return
  }
  func.func @transform_0(%arg0: i32) -> (i32, i32) {
    %c0_i32 = arith.constant 0 : i32
    %c0_i32_0 = arith.constant 0 : i32
    return %arg0, %c0_i32 : i32, i32
  }
  func.func @transform_1(%arg0: i32) -> (i32, i32) {
    %c0_i32 = arith.constant 0 : i32
    %c0_i32_0 = arith.constant 0 : i32
    %c0_i32_1 = arith.constant 0 : i32
    return %c0_i32, %c0_i32_0 : i32, i32
  }
  func.func @transform_2(%arg0: i32) -> (i32, i32) {
    %c0_i32 = arith.constant 0 : i32
    %c0_i32_0 = arith.constant 0 : i32
    %c0_i32_1 = arith.constant 0 : i32
    return %c0_i32, %c0_i32_0 : i32, i32
  }
  func.func @transform_3(%arg0: i32) -> (i32, i32) {
    %c0_i32 = arith.constant 0 : i32
    %c0_i32_0 = arith.constant 0 : i32
    %c0_i32_1 = arith.constant 0 : i32
    return %c0_i32, %c0_i32_0 : i32, i32
  }
  func.func @transform_4(%arg0: i32) -> (i32, i32) {
    %c0_i32 = arith.constant 0 : i32
    %c0_i32_0 = arith.constant 0 : i32
    %c0_i32_1 = arith.constant 0 : i32
    return %c0_i32, %c0_i32_0 : i32, i32
  }
  func.func @transform_5(%arg0: i32) -> (i32, i32) {
    %c0_i32 = arith.constant 0 : i32
    %c0_i32_0 = arith.constant 0 : i32
    %c0_i32_1 = arith.constant 0 : i32
    return %c0_i32, %c0_i32_0 : i32, i32
  }
  func.func @transform_6(%arg0: i32) -> (i32, i32) {
    %c0_i32 = arith.constant 0 : i32
    %c0_i32_0 = arith.constant 0 : i32
    %c0_i32_1 = arith.constant 0 : i32
    return %c0_i32, %c0_i32_0 : i32, i32
  }
  func.func @transform_7(%arg0: i32) -> (i32, i32) {
    %c0_i32 = arith.constant 0 : i32
    %c0_i32_0 = arith.constant 0 : i32
    return %arg0, %c0_i32 : i32, i32
  }
}

</mosaic_0001>

<bundles_post_ra>
// kernel: mlp_forward.1
= control target key start
LH: loop header
LB: loop body
LE: loop exit
PB: predicated region body
PF: predicated region fallthrough
CT: control target
= control target key end

     0   :  { %12 = vsyncpa [#allocation3], 0  ;;  %s1186_s0 = inlined_call_operand.vmem [shape: f32[8,784], index: 0, kind: input, shape index: {}]   ;;  %s1187_s1 = inlined_call_operand.hbm [shape: bf16[784,128], index: 1, kind: input, shape index: {}]   ;;  %s1188_s2 = inlined_call_operand.vmem [shape: f32[1,128], index: 2, kind: input, shape index: {}]   ;;  %s1189_s3 = inlined_call_operand.vmem [shape: bf16[128,64], index: 3, kind: input, shape index: {}]   ;;  %s1190_s4 = inlined_call_operand.vmem [shape: f32[1,64], index: 4, kind: input, shape index: {}]   ;;  %s1191_s5 = inlined_call_operand.vmem [shape: bf16[64,10], index: 5, kind: input, shape index: {}]   ;;  %s1192_s6 = inlined_call_operand.vmem [shape: f32[1,10], index: 6, kind: input, shape index: {}]   ;;  %s1193_s7 = inlined_call_operand.hbm [shape: f32[8,10], index: 7, kind: output, shape index: {}]  }
   0x1   :  { %13 = vsyncpa [#allocation4], 0  ;;  %s20_s26 = sshll.u32 %s1187_s1, 4  ;;  %s1070_s27 = smov [#allocation2]   ;;  %s21_s26 = int_to_ptr.hbm [resolvable:$true] %s20_s26 }
   0x2   :  { %s22_s28 = sshll.u32 %s1070_s27, 4  ;;  %s1071_s29 = smov 64   ;;  %s23_s28 = int_to_ptr.vmem [resolvable:$true] %s22_s28 }
   0x3   :  { %s1072_s30 = smov 4  }
   0x4   :  { %28 = dma.hbm_to_vmem [thread:$0]  %s21_s26, 6272, %s23_s28, [#allocation3], %s1071_s29, %s1071_s29, %s1072_s30  }
   0x5   :  { %1066 = dma.done.wait [#allocation3], 6272  }
   0x6   :  { %1067 = vsyncadd [#allocation3], 4294961024  ;;  %v957_v0 = vld [vmem:[#allocation2 + $0x38] sm:$0xff]  ;;  %v956_v3 = vld [vmem:[#allocation2 + $0x30] sm:$0xff]  ;;  %vm454_vm0 = vcmask 130048   ;;  %vm668_vm1 = vcmask 523264  }
   0x7   :  { %v965_v1 = vld [vmem:[#allocation2 + $0x78] sm:$0xff]  ;;  %458 = vmatpush.bf16.msra.mxu0 %v957_v0  ;;  %v964_v4 = vld [vmem:[#allocation2 + $0x70] sm:$0xff]  ;;  %v955_v8 = vld [vmem:[#allocation2 + $0x28] sm:$0xff]  ;;  %s1073_s24 = smov [#allocation5]   ;;  %vm685_vm2 = vcmask 80896  }
   0x8   :  { %v973_v2 = vld [vmem:[#allocation2 + $0xb8] sm:$0xff]  ;;  %471 = vmatpush.bf16.msra.mxu1 %v965_v1  ;;  %v972_v5 = vld [vmem:[#allocation2 + $0xb0] sm:$0xff]  ;;  %v963_v9 = vld [vmem:[#allocation2 + $0x68] sm:$0xff]  ;;  %s692_s25 = sshll.u32 %s1073_s24, 4  ;;  %s693_s25 = int_to_ptr.vmem [resolvable:$true] %s692_s25 }
   0x9   :  { %484 = vmatpush.bf16.msra.mxu2 %v973_v2  ;;  %v981_v6 = vld [vmem:[#allocation2 + $0xf8] sm:$0xff]  ;;  %v980_v7 = vld [vmem:[#allocation2 + $0xf0] sm:$0xff]  ;;  %v971_v10 = vld [vmem:[#allocation2 + $0xa8] sm:$0xff] }
   0xa   :  { %497 = vmatpush.bf16.msra.mxu3 %v981_v6  ;;  %v979_v11 = vld [vmem:[#allocation2 + $0xe8] sm:$0xff]  ;;  %v954_v12 = vld [vmem:[#allocation2 + $0x20] sm:$0xff]  ;;  %v953_v16 = vld [vmem:[#allocation2 + $0x18] sm:$0xff] }
   0xb   :  { %459 = vmatpush.bf16.msra.mxu0 %v956_v3  ;;  %v962_v13 = vld [vmem:[#allocation2 + $0x60] sm:$0xff]  ;;  %v961_v17 = vld [vmem:[#allocation2 + $0x58] sm:$0xff]  ;;  %v952_v20 = vld [vmem:[#allocation2 + $0x10] sm:$0xff] }
   0xc   :  { %472 = vmatpush.bf16.msra.mxu1 %v964_v4  ;;  %v970_v14 = vld [vmem:[#allocation2 + $0xa0] sm:$0xff]  ;;  %v969_v18 = vld [vmem:[#allocation2 + $0x98] sm:$0xff]  ;;  %v960_v21 = vld [vmem:[#allocation2 + $0x50] sm:$0xff] }
   0xd   :  { %485 = vmatpush.bf16.msra.mxu2 %v972_v5  ;;  %v978_v15 = vld [vmem:[#allocation2 + $0xe0] sm:$0xff]  ;;  %v977_v19 = vld [vmem:[#allocation2 + $0xd8] sm:$0xff]  ;;  %v968_v22 = vld [vmem:[#allocation2 + $0x90] sm:$0xff] }
   0xe   :  { %498 = vmatpush.bf16.msra.mxu3 %v980_v7  ;;  %v976_v23 = vld [vmem:[#allocation2 + $0xd0] sm:$0xff]  ;;  %v951_v24 = vld [vmem:[#allocation2 + $0x8] sm:$0xff]  ;;  %v950_v27 = vld [vmem:[#allocation2] sm:$0xff] }
   0xf   :  { %460 = vmatpush.bf16.msra.mxu0 %v955_v8  ;;  %v959_v25 = vld [vmem:[#allocation2 + $0x48] sm:$0xff]  ;;  %v958_v29 = vld [vmem:[#allocation2 + $0x40] sm:$0xff]  ;;  %v989_v32 = vld [vmem:[#allocation2 + $0x138] sm:$0xff] }
  0x10   :  { %473 = vmatpush.bf16.msra.mxu1 %v963_v9  ;;  %v967_v26 = vld [vmem:[#allocation2 + $0x88] sm:$0xff]  ;;  %v44_v30 = vld [vmem:[%s1186_s0] sm:$0xff]  ;;  %v997_v33 = vld [vmem:[#allocation2 + $0x178] sm:$0xff] }
  0x11   :  { %486 = vmatpush.bf16.msra.mxu2 %v971_v10  ;;  %v975_v28 = vld [vmem:[#allocation2 + $0xc8] sm:$0xff]  ;;  %v966_v34 = vld [vmem:[#allocation2 + $0x80] sm:$0xff]  ;;  %v46_v35 = vld [vmem:[%s1186_s0 + $0x10] sm:$0xff]  ;;  %v51_v36 = vpack.c.bf16 %v44_v30, %v44_v30 }
  0x12   :  { %499 = vmatpush.bf16.msra.mxu3 %v979_v11  ;;  %v45_v31 = vld [vmem:[%s1186_s0 + $0x8] sm:$0xff]  ;;  %v974_v38 = vld [vmem:[#allocation2 + $0xc0] sm:$0xff]  ;;  %v47_v40 = vld [vmem:[%s1186_s0 + $0x18] sm:$0xff]  ;;  %v53_v43 = vpack.c.bf16 %v46_v35, %v46_v35 }
  0x13   :  { %461 = vmatpush.bf16.msra.mxu0 %v954_v12  ;;  %v52_v37 = vpack.c.bf16 %v45_v31, %v45_v31  ;;  %v998_v39 = vld [vmem:[#allocation2 + $0x180] sm:$0xff]  ;;  %v988_v41 = vld [vmem:[#allocation2 + $0x130] sm:$0xff]  ;;  %v54_v44 = vpack.c.bf16 %v47_v40, %v47_v40  ;;  %v987_v45 = vld [vmem:[#allocation2 + $0x128] sm:$0xff] }
  0x14   :  { %474 = vmatpush.bf16.msra.mxu1 %v962_v13  ;;  %v996_v42 = vld [vmem:[#allocation2 + $0x170] sm:$0xff]  ;;  %v995_v46 = vld [vmem:[#allocation2 + $0x168] sm:$0xff]  ;;  %v986_v47 = vld [vmem:[#allocation2 + $0x120] sm:$0xff] }
  0x15   :  { %487 = vmatpush.bf16.msra.mxu2 %v970_v14  ;;  %v994_v48 = vld [vmem:[#allocation2 + $0x160] sm:$0xff]  ;;  %v985_v49 = vld [vmem:[#allocation2 + $0x118] sm:$0xff]  ;;  %v50_v51 = vld [vmem:[%s1186_s0 + $0x30] sm:$0xff] }
  0x16   :  { %500 = vmatpush.bf16.msra.mxu3 %v978_v15  ;;  %v993_v50 = vld [vmem:[#allocation2 + $0x158] sm:$0xff]  ;;  %v984_v52 = vld [vmem:[#allocation2 + $0x110] sm:$0xff]  ;;  %v57_v54 = vpack.c.bf16 %v50_v51, %v50_v51  ;;  %v983_v55 = vld [vmem:[#allocation2 + $0x108] sm:$0xff] }
  0x17   :  { %462 = vmatpush.bf16.msra.mxu0 %v953_v16  ;;  %v992_v53 = vld [vmem:[#allocation2 + $0x150] sm:$0xff]  ;;  %v991_v56 = vld [vmem:[#allocation2 + $0x148] sm:$0xff]  ;;  %v982_v57 = vld [vmem:[#allocation2 + $0x100] sm:$0xff] }
  0x18   :  { %475 = vmatpush.bf16.msra.mxu1 %v961_v17  ;;  %v990_v58 = vld [vmem:[#allocation2 + $0x140] sm:$0xff]  ;;  %v49_v60 = vld [vmem:[%s1186_s0 + $0x28] sm:$0xff]  ;;  %v1006_v63 = vld [vmem:[%s1189_s3 + $0x38] sm:$0xff] }
  0x19   :  { %488 = vmatpush.bf16.msra.mxu2 %v969_v18  ;;  %v48_v59 = vld [vmem:[%s1186_s0 + $0x20] sm:$0xff]  ;;  %v56_v62 = vpack.c.bf16 %v49_v60, %v49_v60  ;;  %v1005_v0 = vld [vmem:[%s1189_s3 + $0x30] sm:$0xff]  ;;  %v1004_v1 = vld [vmem:[%s1189_s3 + $0x28] sm:$0xff] }
  0x1a   :  { %501 = vmatpush.bf16.msra.mxu3 %v977_v19  ;;  %v55_v61 = vpack.c.bf16 %v48_v59, %v48_v59  ;;  %v1003_v2 = vld [vmem:[%s1189_s3 + $0x20] sm:$0xff]  ;;  %v1002_v3 = vld [vmem:[%s1189_s3 + $0x18] sm:$0xff]  ;;  %v1001_v4 = vld [vmem:[%s1189_s3 + $0x10] sm:$0xff] }
  0x1b   :  { %463 = vmatpush.bf16.msra.mxu0 %v952_v20  ;;  %v1000_v5 = vld [vmem:[%s1189_s3 + $0x8] sm:$0xff]  ;;  %v999_v8 = vld [vmem:[%s1189_s3] sm:$0xff]  ;;  %v1010_v9 = vld [vmem:[%s1191_s5 + $0x18] sm:$0xff] }
  0x1c   :  { %476 = vmatpush.bf16.msra.mxu1 %v960_v21  ;;  %v1009_v12 = vld [vmem:[%s1191_s5 + $0x10] sm:$0xff]  ;;  %v1015_v15 = vld [vmem:[%s1188_s2] ss:$0 sm:$0xff]  ;;  %v1008_v16 = vld [vmem:[%s1191_s5 + $0x8] sm:$0xff] }
  0x1d   :  { %489 = vmatpush.bf16.msra.mxu2 %v968_v22 }
  0x1e   :  { %502 = vmatpush.bf16.msra.mxu3 %v976_v23 }
  0x1f   :  { %464 = vmatpush.bf16.msra.mxu0 %v951_v24 }
  0x20   :  { %477 = vmatpush.bf16.msra.mxu1 %v959_v25 }
  0x21   :  { %490 = vmatpush.bf16.msra.mxu2 %v967_v26 }
  0x22   :  { %503 = vmatpush.bf16.msra.mxu3 %v975_v28 }
  0x23   :  { %465 = vmatpush.bf16.msra.mxu0 %v950_v27 }
  0x24   :  { %478 = vmatpush.bf16.msra.mxu1 %v958_v29 }
  0x25   :  { %491 = vmatpush.bf16.msra.mxu2 %v966_v34  ;;  %v1016_v34 = vld [vmem:[%s1190_s4] ss:$0 sm:$0xff] }
  0x26   :  { %466 = vmatmul.bf16.vlgmr.msra.gmra.mxu0 %v51_v36  ;;  %504 = vmatpush.bf16.msra.mxu3 %v974_v38 }
  0x27   :  { %510 = vmatpush.bf16.msrb.mxu0 %v989_v32  ;;  %479 = vmatmul.bf16.vlgmr.msra.gmra.mxu1 %v52_v37 }
  0x28   :  { %523 = vmatpush.bf16.msrb.mxu1 %v997_v33  ;;  %492 = vmatmul.bf16.vlgmr.msra.gmra.mxu2 %v53_v43  ;;  %v1007_v33 = vld [vmem:[%s1191_s5] sm:$0xff]  ;;  %s694_s5 = sshll.u32 %s1193_s7, 4  ;;  %s695_s5 = int_to_ptr.hbm [resolvable:$true] %s694_s5 }
  0x29   :  { %543 = vmatpush.bf16.msrb.mxu2 %v998_v39  ;;  %505 = vmatmul.bf16.vlgmr.msra.gmra.mxu3 %v54_v44  ;;  %v1017_v39 = vld [vmem:[%s1192_s6] ss:$0 sm:$0xff] }
  0x2a   :  { %618 = vmatpush.bf16.msrb.mxu3 %v1006_v63 }
  0x2b   :  { %511 = vmatpush.bf16.msrb.mxu0 %v988_v41 }
  0x2c   :  { %524 = vmatpush.bf16.msrb.mxu1 %v996_v42 }
  0x2d   :  { %676 = vmatpush.bf16.msra.mxu2 %v1010_v9 }
  0x2e   :  { %619 = vmatpush.bf16.msrb.mxu3 %v1005_v0 }
  0x2f   :  { %512 = vmatpush.bf16.msrb.mxu0 %v987_v45 }
  0x30   :  { %525 = vmatpush.bf16.msrb.mxu1 %v995_v46 }
  0x31   :  { %677 = vmatpush.bf16.msra.mxu2 %v1009_v12 }
  0x32   :  { %620 = vmatpush.bf16.msrb.mxu3 %v1004_v1 }
  0x33   :  { %513 = vmatpush.bf16.msrb.mxu0 %v986_v47 }
  0x34   :  { %526 = vmatpush.bf16.msrb.mxu1 %v994_v48 }
  0x35   :  { %678 = vmatpush.bf16.msra.mxu2 %v1008_v16 }
  0x36   :  { %621 = vmatpush.bf16.msrb.mxu3 %v1003_v2 }
  0x37   :  { %514 = vmatpush.bf16.msrb.mxu0 %v985_v49 }
  0x38   :  { %527 = vmatpush.bf16.msrb.mxu1 %v993_v50  ;;  %900 = vmatmul.msk.bf16.vlgmr.msrb.gmra.mxu2 %vm454_vm0, %v57_v54 }
  0x39   :  { %679 = vmatpush.bf16.msra.mxu2 %v1007_v33 }
  0x3a   :  { %622 = vmatpush.bf16.msrb.mxu3 %v1002_v3 }
  0x3b   :  { %515 = vmatpush.bf16.msrb.mxu0 %v984_v52 }
  0x3c   :  { %528 = vmatpush.bf16.msrb.mxu1 %v992_v53 }
  0x3e   :  { %623 = vmatpush.bf16.msrb.mxu3 %v1001_v4 }
  0x3f   :  { %516 = vmatpush.bf16.msrb.mxu0 %v983_v55 }
  0x40   :  { %529 = vmatpush.bf16.msrb.mxu1 %v991_v56 }
  0x42   :  { %624 = vmatpush.bf16.msrb.mxu3 %v1000_v5 }
  0x43   :  { %517 = vmatpush.bf16.msrb.mxu0 %v982_v57 }
  0x44   :  { %530 = vmatpush.bf16.msrb.mxu1 %v990_v58 }
  0x46   :  { %518 = vmatmul.bf16.vlgmr.msrb.gmra.mxu0 %v55_v61  ;;  %625 = vmatpush.bf16.msrb.mxu3 %v999_v8 }
  0x47   :  { %531 = vmatmul.bf16.vlgmr.msrb.gmra.mxu1 %v56_v62 }
  0xa3   :  { %v467_v6 = vpop.f32.mrf.mxu0 }
  0xa4   :  { %v480_v7 = vpop.f32.mrf.mxu1  ;;  %v468_v17 = vadd.f32 %v1015_v15, %v467_v6 }
  0xa6   :  { %v481_v20 = vadd.f32 %v480_v7, %v468_v17 }
  0xab   :  { %v469_v10 = vpop.f32.mrf.mxu0  ;;  %v493_v13 = vpop.f32.mrf.mxu2 }
  0xac   :  { %v482_v11 = vpop.f32.mrf.mxu1  ;;  %v506_v14 = vpop.f32.mrf.mxu3  ;;  %v494_v21 = vadd.f32 %v493_v13, %v481_v20 }
  0xae   :  { %v507_v23 = vadd.f32 %v506_v14, %v494_v21 }
  0xb3   :  { %v495_v18 = vpop.f32.mrf.mxu2 }
  0xb4   :  { %v508_v19 = vpop.f32.mrf.mxu3 }
  0xbb   :  { %v545_v22 = vpop.f32.mrf.mxu2 }
  0xc3   :  { %v519_v24 = vpop.f32.mrf.mxu0  ;;  %v547_v28 = vpop.f32.mrf.mxu2 }
  0xc4   :  { %v532_v25 = vpop.f32.mrf.mxu1  ;;  %v520_v26 = vadd.f32 %v519_v24, %v507_v23 }
  0xc6   :  { %v533_v27 = vadd.f32 %v532_v25, %v520_v26 }
  0xc8   :  { %v546_v29 = vadd.f32 %v545_v22, %v533_v27 }
  0xca   :  { %v549_v30 = vpack.c.bf16 %v546_v29, %v546_v29 }
  0xcb   :  { %v521_v31 = vpop.f32.mrf.mxu0 }
  0xcc   :  { %v534_v32 = vpop.f32.mrf.mxu1  ;;  %626 = vmatmul.bf16.vlgmr.msrb.gmra.mxu3 %v549_v30 }
 0x14f   :  { %v627_v35 = vpop.f32.mrf.mxu3 }
 0x150   :  { %v628_v36 = vadd.f32 %v1016_v34, %v627_v35 }
 0x152   :  { %v631_v37 = vpack.c.bf16 %v628_v36, %v628_v36 }
 0x154   :  { %949 = vmatmul.msk.bf16.vlgmr.msra.gmra.mxu2 %vm668_vm1, %v631_v37 }
 0x157   :  { %v629_v38 = vpop.f32.mrf.mxu3 }
 0x1d7   :  { %v681_v40 = vpop.f32.mrf.mxu2 }
 0x1d8   :  { %v682_v41 = vadd.f32 %v1017_v39, %v681_v40 }
 0x1da   :  { %686 = vst.msk [vmem:[#allocation5] sm:$0xff] %vm685_vm2, %v682_v41 }
 0x1db   :  { %697 = dma.vmem_to_hbm [thread:$0]  %s693_s25, 128, %s695_s5, [#allocation4]  }
 0x1df   :  { %v683_v42 = vpop.f32.mrf.mxu2 }
 0x1e0   :  { %1068 = dma.done.wait [#allocation4], 128  }
 0x1e1   :  { %1069 = vsyncadd [#allocation4], 4294967168 }
 0x1e2   :  { %702 = vsyncpa [#allocation3], 1 }
 0x1e3   :  { %703 = vsyncpa [#allocation4], 1 }

</bundles_post_ra>
